<compile_context>
chip_gen: v5e
topology: v5e:2x2
jax: 0.10.0
libtpu: 0.0.40
codegen_flags: <defaults>
</compile_context>

<pallas_src>
import functools

import jax
import jax.numpy as jnp
from jax.experimental import pallas as pl
from jax.experimental.pallas import tpu as pltpu


def _round_up(x, m):
    return ((x + m - 1) // m) * m


def _spatial_conv2d_kernel(x_ref, wh_ref, bh_ref, ww_ref, bw_ref,
                           hmask_ref, wmask_ref, o_ref, *, W, k, HWp):
    """One (batch, channel-tile) block: depthwise conv along H, then along W.

    Layout: channels on sublanes, flattened (128-padded) H*W on the lane axis.
      x_ref     : (1, cb, HWp)  input block
      wh_ref    : (cb, k)       H-conv taps;   bh_ref: (cb, 1) bias
      ww_ref    : (cb, k)       W-conv taps;   bw_ref: (cb, 1) bias
      hmask_ref : (k, HWp)      0/1 validity mask per H-conv tap (top/bottom rows)
      wmask_ref : (k, HWp)      0/1 validity mask per W-conv tap (row boundaries)
      o_ref     : (1, cb, HWp)  output block
    """
    p = k // 2
    x = x_ref[0].astype(jnp.float32)                       # (cb, HWp)
    wh = wh_ref[...].astype(jnp.float32)                   # (cb, k)
    bh = bh_ref[...].astype(jnp.float32)                   # (cb, 1)
    ww = ww_ref[...].astype(jnp.float32)
    bw = bw_ref[...].astype(jnp.float32)

    # ---- pass 1: depthwise 1-D conv along H (roll by whole rows of W lanes) ----
    acc = x * wh[:, p:p + 1]                               # centre tap, always valid
    for i in range(k):
        if i == p:
            continue
        d = i - p                                          # tap offset in rows
        # shifted[row*W + col] == x[(row + d)*W + col]   (XLU lane rotation)
        shifted = pltpu.roll(x, shift=(-d * W) % HWp, axis=1)
        acc = acc + shifted * hmask_ref[i:i + 1, :] * wh[:, i:i + 1]
    y = acc + bh                                           # (cb, HWp); stays on-core

    # ---- pass 2: depthwise 1-D conv along W (roll by +-d lanes + row mask) ----
    acc2 = y * ww[:, p:p + 1]
    for i in range(k):
        if i == p:
            continue
        d = i - p                                          # tap offset in lanes
        # shifted[row*W + col] == y[row*W + col + d]; mask kills cross-row bleed.
        shifted = pltpu.roll(y, shift=(-d) % HWp, axis=1)
        acc2 = acc2 + shifted * wmask_ref[i:i + 1, :] * ww[:, i:i + 1]

    o_ref[0] = (acc2 + bw).astype(o_ref.dtype)


def _vmem_limit_bytes():
    """Generation-aware scoped-VMEM request (v7x: 64 MiB/TC; v5e/v6e: 128 MiB)."""
    cap = 128 * 1024 * 1024
    try:
        cap = int(getattr(pltpu.get_tpu_info(), "vmem_capacity_bytes", cap))
    except Exception:
        pass
    # Leave half the physical VMEM as headroom; never ask for more than 64 MiB.
    return min(cap // 2, 64 * 1024 * 1024)


def _pick_c_block(C, HWp, slab_budget_bytes, n_batch):
    """Largest channel tile that (a) divides C, (b) is a multiple of 8 or == C
    (BlockSpec sublane rule), (c) keeps one f32 slab under slab_budget_bytes so
    double-buffered in/out blocks plus live temporaries fit scoped VMEM, and
    (d) leaves >= 2 grid steps when possible so both v7x TensorCores get work."""
    legal = [d for d in range(1, C + 1)
             if C % d == 0 and (d % 8 == 0 or d == C)]
    fitting = [d for d in legal if d * HWp * 4 <= slab_budget_bytes]
    cb = max(fitting) if fitting else min(legal)
    if n_batch * (C // cb) < 2:
        smaller = [d for d in legal if d < cb]
        if smaller:
            cb = max(smaller)
    return cb


def spatial_conv2d(x_nchw, wh, bh, ww, bw):
    """Depthwise ParC SpatialConv2d forward.

    x_nchw: (N, C, H, W) (PyTorch layout).
    wh, ww: (k, C) per-channel taps of conv_h / conv_w.  bh, bw: (C,) biases.
    """
    N, C, H, W = x_nchw.shape
    k = int(wh.shape[0])
    assert k % 2 == 1, "SpatialConv2d requires an odd kernel size"
    p = k // 2
    HW = H * W
    HWp = _round_up(HW, 128)                 # lane-dense: multiple of 128

    # Free reshape (merges the trailing contiguous H,W dims); pad lanes to HWp.
    x2 = x_nchw.reshape(N, C, HW)
    if HWp != HW:
        x2 = jnp.pad(x2, ((0, 0), (0, 0), (0, HWp - HW)))

    wh_ck = jnp.transpose(wh).astype(jnp.float32)          # (C, k)  tiny
    ww_ck = jnp.transpose(ww).astype(jnp.float32)
    bh2 = bh.reshape(C, 1).astype(jnp.float32)
    bw2 = bw.reshape(C, 1).astype(jnp.float32)

    # Precomputed per-tap validity masks (shared across batch and channels).
    idx = jnp.arange(HWp, dtype=jnp.int32)
    row, col, valid = idx // W, idx % W, idx < HW
    hmask = jnp.stack(
        [(valid & (row + (i - p) >= 0) & (row + (i - p) < H)).astype(jnp.float32)
         for i in range(k)], axis=0)                        # (k, HWp)
    wmask = jnp.stack(
        [(valid & (col + (i - p) >= 0) & (col + (i - p) < W)).astype(jnp.float32)
         for i in range(k)], axis=0)                        # (k, HWp)

    vmem_limit = _vmem_limit_bytes()
    # Budget one f32 slab against ~12 live slabs (2x in + 2x out double-buffers
    # plus unrolled per-tap temporaries inside the kernel body).
    cb = _pick_c_block(C, HWp, vmem_limit // 12, N)
    grid = (N, C // cb)

    kernel = functools.partial(_spatial_conv2d_kernel, W=W, k=k, HWp=HWp)

    out2 = pl.pallas_call(
        kernel,
        out_shape=jax.ShapeDtypeStruct((N, C, HWp), x_nchw.dtype),
        grid=grid,
        in_specs=[
            pl.BlockSpec((1, cb, HWp), lambda n, c: (n, c, 0)),
            pl.BlockSpec((cb, k), lambda n, c: (c, 0)),
            pl.BlockSpec((cb, 1), lambda n, c: (c, 0)),
            pl.BlockSpec((cb, k), lambda n, c: (c, 0)),
            pl.BlockSpec((cb, 1), lambda n, c: (c, 0)),
            pl.BlockSpec((k, HWp), lambda n, c: (0, 0)),
            pl.BlockSpec((k, HWp), lambda n, c: (0, 0)),
        ],
        out_specs=pl.BlockSpec((1, cb, HWp), lambda n, c: (n, c, 0)),
        compiler_params=pltpu.CompilerParams(
            dimension_semantics=("parallel", "parallel"),
            vmem_limit_bytes=int(vmem_limit)),
    )(x2, wh_ck, bh2, ww_ck, bw2, hmask, wmask)

    out = out2[..., :HW] if HWp != HW else out2
    return out.reshape(N, C, H, W)


def ref_forward(x_nchw, wh, bh, ww, bw):
    """Plain-JAX reference matching PyTorch Conv2d(groups=dim) semantics."""
    C = x_nchw.shape[1]
    k = wh.shape[0]
    p = k // 2
    rh = jnp.transpose(wh)[:, None, :, None]       # (C, 1, k, 1) OIHW
    y = jax.lax.conv_general_dilated(
        x_nchw, rh, window_strides=(1, 1), padding=((p, p), (0, 0)),
        dimension_numbers=("NCHW", "OIHW", "NCHW"), feature_group_count=C,
        precision=jax.lax.Precision.HIGHEST,
    ) + bh[None, :, None, None]
    rw = jnp.transpose(ww)[:, None, None, :]       # (C, 1, 1, k) OIHW
    y = jax.lax.conv_general_dilated(
        y, rw, window_strides=(1, 1), padding=((0, 0), (p, p)),
        dimension_numbers=("NCHW", "OIHW", "NCHW"), feature_group_count=C,
        precision=jax.lax.Precision.HIGHEST,
    ) + bw[None, :, None, None]
    return y


if __name__ == "__main__":
    def run_case(case_idx, N, dim, kernel_size, H, W):
        key = jax.random.fold_in(jax.random.PRNGKey(0), case_idx)
        kx, k1, k2, k3, k4 = jax.random.split(key, 5)
        x = jax.random.normal(kx, (N, dim, H, W), dtype=jnp.float32)
        # Deterministic parameter init (uniform, ~ PyTorch Conv2d fan_in scaling).
        bound = 1.0 / (kernel_size ** 0.5)
        wh = jax.random.uniform(k1, (kernel_size, dim), jnp.float32, -bound, bound)
        bh = jax.random.uniform(k2, (dim,), jnp.float32, -bound, bound)
        ww = jax.random.uniform(k3, (kernel_size, dim), jnp.float32, -bound, bound)
        bw = jax.random.uniform(k4, (dim,), jnp.float32, -bound, bound)

        out = jax.block_until_ready(spatial_conv2d(x, wh, bh, ww, bw))
        ref = jax.block_until_ready(ref_forward(x, wh, bh, ww, bw))

        assert out.shape == (N, dim, H, W)
        assert jnp.allclose(out, ref, atol=1e-5, rtol=1e-5), (
            f"mismatch vs reference in case {case_idx}")

    # Module config: dim=4, kernel_size=3, hidden_ratio=1.0 (depthwise).
    run_case(0, N=2, dim=4, kernel_size=3, H=16, W=16)
    # H*W not a multiple of 128 (lane padding path), larger k, single batch.
    run_case(1, N=1, dim=8, kernel_size=5, H=14, W=14)

    print("KERNEL_OK")
</pallas_src>

<mosaic_0001>
module attributes {stable_mosaic.version = 11 : i64} {
  func.func @_spatial_conv2d_kernel(%arg0: i32, %arg1: i32, %arg2: memref<1x4x256xf32, #tpu.memory_space<vmem>>, %arg3: memref<4x3xf32, #tpu.memory_space<vmem>>, %arg4: memref<4x1xf32, #tpu.memory_space<vmem>>, %arg5: memref<4x3xf32, #tpu.memory_space<vmem>>, %arg6: memref<4x1xf32, #tpu.memory_space<vmem>>, %arg7: memref<3x256xf32, #tpu.memory_space<vmem>>, %arg8: memref<3x256xf32, #tpu.memory_space<vmem>>, %arg9: memref<1x4x256xf32, #tpu.memory_space<vmem>>) attributes {dimension_semantics = [#tpu.dimension_semantics<parallel>, #tpu.dimension_semantics<parallel>], iteration_bounds = array<i64: 2, 1>, scalar_prefetch = 0 : i64, scratch_operands = 0 : i64, tpu.core_type = #tpu.core_type<tc>, window_params = [{transform_indices = @transform_0, window_bounds = array<i64: 1, 4, 256>}, {transform_indices = @transform_1, window_bounds = array<i64: 4, 3>}, {transform_indices = @transform_2, window_bounds = array<i64: 4, 1>}, {transform_indices = @transform_3, window_bounds = array<i64: 4, 3>}, {transform_indices = @transform_4, window_bounds = array<i64: 4, 1>}, {pipeline_mode = #tpu.pipeline_mode<synchronous>, transform_indices = @transform_5, window_bounds = array<i64: 3, 256>}, {pipeline_mode = #tpu.pipeline_mode<synchronous>, transform_indices = @transform_6, window_bounds = array<i64: 3, 256>}, {transform_indices = @transform_7, window_bounds = array<i64: 1, 4, 256>}]} {
    %c0 = arith.constant 0 : index
    %c0_0 = arith.constant 0 : index
    %c0_1 = arith.constant 0 : index
    %0 = vector.load %arg2[%c0, %c0_0, %c0_1] : memref<1x4x256xf32, #tpu.memory_space<vmem>>, vector<1x4x256xf32>
    %1 = vector.shape_cast %0 : vector<1x4x256xf32> to vector<4x256xf32>
    %c0_2 = arith.constant 0 : index
    %c0_3 = arith.constant 0 : index
    %2 = vector.load %arg3[%c0_2, %c0_3] : memref<4x3xf32, #tpu.memory_space<vmem>>, vector<4x3xf32>
    %c0_4 = arith.constant 0 : index
    %c0_5 = arith.constant 0 : index
    %3 = vector.load %arg4[%c0_4, %c0_5] : memref<4x1xf32, #tpu.memory_space<vmem>>, vector<4x1xf32>
    %c0_6 = arith.constant 0 : index
    %c0_7 = arith.constant 0 : index
    %4 = vector.load %arg5[%c0_6, %c0_7] : memref<4x3xf32, #tpu.memory_space<vmem>>, vector<4x3xf32>
    %c0_8 = arith.constant 0 : index
    %c0_9 = arith.constant 0 : index
    %5 = vector.load %arg6[%c0_8, %c0_9] : memref<4x1xf32, #tpu.memory_space<vmem>>, vector<4x1xf32>
    %6 = vector.extract_strided_slice %2 {offsets = [0, 1], sizes = [4, 1], strides = [1, 1]} : vector<4x3xf32> to vector<4x1xf32>
    %7 = vector.broadcast %6 : vector<4x1xf32> to vector<4x256xf32>
    %8 = arith.mulf %1, %7 : vector<4x256xf32>
    %c16_i32 = arith.constant 16 : i32
    %9 = tpu.dynamic_rotate %1 by %c16_i32 dim 1 : vector<4x256xf32>, i32 -> vector<4x256xf32>
    %c0_10 = arith.constant 0 : index
    %c0_11 = arith.constant 0 : index
    %10 = vector.load %arg7[%c0_10, %c0_11] : memref<3x256xf32, #tpu.memory_space<vmem>>, vector<1x256xf32>
    %11 = vector.broadcast %10 : vector<1x256xf32> to vector<4x256xf32>
    %12 = arith.mulf %9, %11 : vector<4x256xf32>
    %13 = vector.extract_strided_slice %2 {offsets = [0, 0], sizes = [4, 1], strides = [1, 1]} : vector<4x3xf32> to vector<4x1xf32>
    %14 = vector.broadcast %13 : vector<4x1xf32> to vector<4x256xf32>
    %15 = arith.mulf %12, %14 : vector<4x256xf32>
    %16 = arith.addf %8, %15 : vector<4x256xf32>
    %c240_i32 = arith.constant 240 : i32
    %17 = tpu.dynamic_rotate %1 by %c240_i32 dim 1 : vector<4x256xf32>, i32 -> vector<4x256xf32>
    %c2 = arith.constant 2 : index
    %c0_12 = arith.constant 0 : index
    %18 = vector.load %arg7[%c2, %c0_12] : memref<3x256xf32, #tpu.memory_space<vmem>>, vector<1x256xf32>
    %19 = vector.broadcast %18 : vector<1x256xf32> to vector<4x256xf32>
    %20 = arith.mulf %17, %19 : vector<4x256xf32>
    %21 = vector.extract_strided_slice %2 {offsets = [0, 2], sizes = [4, 1], strides = [1, 1]} : vector<4x3xf32> to vector<4x1xf32>
    %22 = vector.broadcast %21 : vector<4x1xf32> to vector<4x256xf32>
    %23 = arith.mulf %20, %22 : vector<4x256xf32>
    %24 = arith.addf %16, %23 : vector<4x256xf32>
    %25 = vector.broadcast %3 : vector<4x1xf32> to vector<4x256xf32>
    %26 = arith.addf %24, %25 : vector<4x256xf32>
    %27 = vector.extract_strided_slice %4 {offsets = [0, 1], sizes = [4, 1], strides = [1, 1]} : vector<4x3xf32> to vector<4x1xf32>
    %28 = vector.broadcast %27 : vector<4x1xf32> to vector<4x256xf32>
    %29 = arith.mulf %26, %28 : vector<4x256xf32>
    %c1_i32 = arith.constant 1 : i32
    %30 = tpu.dynamic_rotate %26 by %c1_i32 dim 1 : vector<4x256xf32>, i32 -> vector<4x256xf32>
    %c0_13 = arith.constant 0 : index
    %c0_14 = arith.constant 0 : index
    %31 = vector.load %arg8[%c0_13, %c0_14] : memref<3x256xf32, #tpu.memory_space<vmem>>, vector<1x256xf32>
    %32 = vector.broadcast %31 : vector<1x256xf32> to vector<4x256xf32>
    %33 = arith.mulf %30, %32 : vector<4x256xf32>
    %34 = vector.extract_strided_slice %4 {offsets = [0, 0], sizes = [4, 1], strides = [1, 1]} : vector<4x3xf32> to vector<4x1xf32>
    %35 = vector.broadcast %34 : vector<4x1xf32> to vector<4x256xf32>
    %36 = arith.mulf %33, %35 : vector<4x256xf32>
    %37 = arith.addf %29, %36 : vector<4x256xf32>
    %c255_i32 = arith.constant 255 : i32
    %38 = tpu.dynamic_rotate %26 by %c255_i32 dim 1 : vector<4x256xf32>, i32 -> vector<4x256xf32>
    %c2_15 = arith.constant 2 : index
    %c0_16 = arith.constant 0 : index
    %39 = vector.load %arg8[%c2_15, %c0_16] : memref<3x256xf32, #tpu.memory_space<vmem>>, vector<1x256xf32>
    %40 = vector.broadcast %39 : vector<1x256xf32> to vector<4x256xf32>
    %41 = arith.mulf %38, %40 : vector<4x256xf32>
    %42 = vector.extract_strided_slice %4 {offsets = [0, 2], sizes = [4, 1], strides = [1, 1]} : vector<4x3xf32> to vector<4x1xf32>
    %43 = vector.broadcast %42 : vector<4x1xf32> to vector<4x256xf32>
    %44 = arith.mulf %41, %43 : vector<4x256xf32>
    %45 = arith.addf %37, %44 : vector<4x256xf32>
    %46 = vector.broadcast %5 : vector<4x1xf32> to vector<4x256xf32>
    %47 = arith.addf %45, %46 : vector<4x256xf32>
    %c0_17 = arith.constant 0 : index
    %c0_18 = arith.constant 0 : index
    %c0_19 = arith.constant 0 : index
    %48 = vector.load %arg9[%c0_17, %c0_18, %c0_19] : memref<1x4x256xf32, #tpu.memory_space<vmem>>, vector<1x4x256xf32>
    %49 = vector.shape_cast %48 : vector<1x4x256xf32> to vector<4x256xf32>
    %50 = vector.shape_cast %47 : vector<4x256xf32> to vector<1x4x256xf32>
    tpu.vector_store %arg9[%c0_17, %c0_18, %c0_19], %50 {strides = array<i32>} : memref<1x4x256xf32, #tpu.memory_space<vmem>>, vector<1x4x256xf32>,
    return
  }
  func.func @transform_0(%arg0: i32, %arg1: i32) -> (i32, i32, i32) {
    %c0_i32 = arith.constant 0 : i32
    %c0_i32_0 = arith.constant 0 : i32
    return %arg0, %arg1, %c0_i32 : i32, i32, i32
  }
  func.func @transform_1(%arg0: i32, %arg1: i32) -> (i32, i32) {
    %c0_i32 = arith.constant 0 : i32
    %c0_i32_0 = arith.constant 0 : i32
    return %arg1, %c0_i32 : i32, i32
  }
  func.func @transform_2(%arg0: i32, %arg1: i32) -> (i32, i32) {
    %c0_i32 = arith.constant 0 : i32
    %c0_i32_0 = arith.constant 0 : i32
    return %arg1, %c0_i32 : i32, i32
  }
  func.func @transform_3(%arg0: i32, %arg1: i32) -> (i32, i32) {
    %c0_i32 = arith.constant 0 : i32
    %c0_i32_0 = arith.constant 0 : i32
    return %arg1, %c0_i32 : i32, i32
  }
  func.func @transform_4(%arg0: i32, %arg1: i32) -> (i32, i32) {
    %c0_i32 = arith.constant 0 : i32
    %c0_i32_0 = arith.constant 0 : i32
    return %arg1, %c0_i32 : i32, i32
  }
  func.func @transform_5(%arg0: i32, %arg1: i32) -> (i32, i32) {
    %c0_i32 = arith.constant 0 : i32
    %c0_i32_0 = arith.constant 0 : i32
    %c0_i32_1 = arith.constant 0 : i32
    return %c0_i32, %c0_i32_0 : i32, i32
  }
  func.func @transform_6(%arg0: i32, %arg1: i32) -> (i32, i32) {
    %c0_i32 = arith.constant 0 : i32
    %c0_i32_0 = arith.constant 0 : i32
    %c0_i32_1 = arith.constant 0 : i32
    return %c0_i32, %c0_i32_0 : i32, i32
  }
  func.func @transform_7(%arg0: i32, %arg1: i32) -> (i32, i32, i32) {
    %c0_i32 = arith.constant 0 : i32
    %c0_i32_0 = arith.constant 0 : i32
    return %arg0, %arg1, %c0_i32 : i32, i32, i32
  }
}

</mosaic_0001>

<bundles_post_ra>
// kernel: tpu_custom_call.1
= control target key start
LH: loop header
LB: loop body
LE: loop exit
PB: predicated region body
PF: predicated region fallthrough
CT: control target
= control target key end

     0   :  { %s1343_s0 = inlined_call_operand.hbm [shape: f32[2,4,256], index: 0, kind: input, shape index: {}]   ;;  %s1344_s1 = inlined_call_operand.hbm [shape: f32[4,3], index: 1, kind: input, shape index: {}]   ;;  %s1345_s2 = inlined_call_operand.vmem [shape: f32[4,1], index: 2, kind: input, shape index: {}]   ;;  %s1346_s3 = inlined_call_operand.hbm [shape: f32[4,3], index: 3, kind: input, shape index: {}]   ;;  %s1347_s4 = inlined_call_operand.vmem [shape: f32[4,1], index: 4, kind: input, shape index: {}]   ;;  %s1348_s5 = inlined_call_operand.vmem [shape: f32[3,256], index: 5, kind: input, shape index: {}]   ;;  %s1349_s6 = inlined_call_operand.hbm [shape: f32[3,256], index: 6, kind: input, shape index: {}]   ;;  %s1350_s7 = inlined_call_operand.hbm [shape: f32[2,4,256], index: 7, kind: output, shape index: {}]  }
   0x1   :  { %1351 = sst [smem:[#allocation15_spill]] %s1344_s1 }
   0x2   :  { %1352 = sst [smem:[#allocation16_spill]] %s1346_s3 }
   0x3   :  { %1353 = sst [smem:[#allocation17_spill]] %s1349_s6 }
   0x4   :  { %12 = vsyncpa [#allocation3], 0 }
   0x5   :  { %14 = vsyncpa [#allocation3 + $0x1], 0 }
   0x6   :  { %15 = vsyncpa [#allocation6], 0 }
   0x7   :  { %16 = vsyncpa [#allocation9], 0 }
   0x8   :  { %17 = vsyncpa [#allocation4], 0 }
   0x9   :  { %19 = vsyncpa [#allocation4 + $0x1], 0  ;;  %s1149_s24 = smov 0   ;;  %s1151_s25 = smov 0  }
   0xa   :  { %s1153_s26 = smov 0   ;;  %s1155_s27 = smov 0  }
   0xb   :  { %s1157_s28 = smov 0   ;;  %s1159_s29 = smov 0  }
   0xc LB: > { %s754_s30 = sadd.s32 4294967295, %s1096_s29   ;;  %s755_s8 = sadd.s32 4294967294, %s1096_s29   ;;  %s1096_s29 = sphi %s1159_s29, %s25_s29   ;;  %s1092_s28 = sphi %s1157_s28, %s1368_s28   ;;  %s1088_s27 = sphi %s1155_s27, %s1367_s27   ;;  %s1084_s26 = sphi %s1153_s26, %s1366_s26   ;;  %s1080_s25 = sphi %s1151_s25, %s1365_s25   ;;  %s1076_s24 = sphi %s1149_s24, %s1364_s24  }
   0xd   : > { %p59_p0 = scmp.ne.s32.totalorder %s1080_s25, %s1076_s24  ;;  %p1183_p1 = scmp.eq.s32.totalorder %s754_s30, 0 }
   0xe   : > { %p1187_p2 = scmp.eq.s32.totalorder %s754_s30, 1  ;;  %p237_p3 = scmp.eq.s32.totalorder %s755_s8, 1 }
   0xf   : > { %p1193_p4 = por %p1183_p1, %p59_p0  ;;  %p756_p5 = scmp.ge.s32.totalorder %s1096_s29, 1 }
  0x10   : > { %p1198_p6 = por %p237_p3, %p59_p0  ;;  %p244_p7 = scmp.lt.s32.totalorder %s1096_s29, 3 }
  0x11   : > { %s1358_s1 = sld [smem:[#allocation15_spill]]  ;;  %p762_p9 = scmp.ge.s32.totalorder %s1096_s29, 2 }
  0x12   : > { %p1206_p8 = pnand %p756_p5, %p244_p7  ;;  %s1098_s17 = smov [#allocation5]  }
  0x13   : > { %s260_s18 = sshll.u32 %s1098_s17, 4  ;;  %s1360_s3 = sld [smem:[#allocation16_spill]]  ;;  %s261_s18 = int_to_ptr.vmem [resolvable:$true] %s260_s18 }
  0x14   : > { %p796_p10 = pneg %p1206_p8  ;;  %s1361_s6 = sld [smem:[#allocation17_spill]] }
  0x15   : > { %s1099_s8 = smov [#allocation7]   ;;  %s1100_s14 = smov [#allocation8]  }
  0x16   : > { %p797_p11 = pnand %p796_p10, %p1183_p1  ;;  %s281_s13 = sshll.u32 %s1099_s8, 4  ;;  %s282_s13 = int_to_ptr.vmem [resolvable:$true] %s281_s13 }
  0x17   : > { %s258_s15 = sshll.u32 %s1358_s1, 4  ;;  %s303_s17 = sshll.u32 %s1100_s14, 4  ;;  %s259_s15 = int_to_ptr.hbm [resolvable:$true] %s258_s15  ;;  %s304_s17 = int_to_ptr.vmem [resolvable:$true] %s303_s17 }
  0x18   : > { %799 = dma.hbm_to_vmem [thread:$0]  (!%p797_p11), %s259_s15, 64, %s261_s18, [#allocation6]  }
  0x19   : > { %s279_s21 = sshll.u32 %s1360_s3, 4  ;;  %s37_s19 = sadd.s32 1, %s1092_s28  ;;  %s280_s21 = int_to_ptr.hbm [resolvable:$true] %s279_s21 }
  0x1a   : > { %s301_s30 = sshll.u32 %s1361_s6, 4  ;;  %p39_p12 = scmp.ge.s32.totalorder %s37_s19, 2  ;;  %s302_s30 = int_to_ptr.hbm [resolvable:$true] %s301_s30 }
  0x1b   : > { %802 = dma.hbm_to_vmem [thread:$0]  (!%p797_p11), %s280_s21, 64, %s282_s13, [#allocation6]  }
  0x1c   : > { %805 = dma.hbm_to_vmem [thread:$0]  (!%p797_p11), %s302_s30, 128, %s304_s17, [#allocation9]  }
  0x1d   : > { %s46_s20 = sadd.s32 1, %s1084_s26  ;;  %p53_p13 = scmp.ne.s32.totalorder %s1084_s26, %s1080_s25 }
  0x1e   : > { %p54_p0 = scmp.eq.s32.totalorder %s1096_s29, 0  ;;  %s1370_s19 = smov (%p39_p12, %s37_s19), 0 }
  0x1f   : > { %p1234_p5 = por %p1187_p2, %p53_p13  ;;  %s41_s21 = ssub.s32 %s1092_s28, %s1370_s19 }
  0x20   : > { %p1228_p3 = por %p54_p0, %p53_p13  ;;  %p817_p7 = scmp.lt.s32.totalorder %s1096_s29, 2 }
  0x21   : > { %p44_p10 = scmp.eq.s32.totalorder %s41_s21, 0  ;;  %s314_s22 = sand.u32 1, %s1084_s26  }
  0x22   : > { %s763_s23 = sshll.u32 %s314_s22, 3  ;;  %s778_s8 = sshll.u32 %s1092_s28, 3 }
  0x23   : > { %s1243_s30 = scalar_select %p44_p10, %s1084_s26, %s46_s20  }
  0x24   : > { %s325_s17 = scalar_lea.hbm %s1343_s0, %s778_s8  ;;  %s318_s1 = scalar_lea.vmem [#allocation2], %s763_s23 }
  0x25   : > { %s329_s3 = sshll.u32 %s318_s1, 4  ;;  %s327_s10 = sshll.u32 %s325_s17, 4  ;;  %s330_s3 = int_to_ptr.vmem [resolvable:$true] %s329_s3  ;;  %s328_s10 = int_to_ptr.hbm [resolvable:$true] %s327_s10 }
  0x26   : > { %p807_p2 = pnand %p817_p7, %p1228_p3  ;;  %s315_s6 = scalar_lea.sflag [#allocation3], %s314_s22 }
  0x27   : > { %338 = sbr.rel (%p1206_p8) target bundleno = 352 (0x160), region = 48  ;;  %s1254_s20 = sand.u32 (!%p1206_p8), 1, %s1080_s25  }
  0x28   : > { %809 = dma.hbm_to_vmem [thread:$0]  (!%p807_p2), %s328_s10, 128, %s330_s3, %s315_s6  }
  0x29   : > { %s767_s21 = sshll.u32 (!%p1206_p8), %s1254_s20, 3  ;;  %s341_s23 = scalar_lea.sflag (!%p1206_p8), [#allocation3], %s1254_s20 }
  0x2a   : > { %s344_s1 = scalar_lea.vmem (!%p1206_p8), [#allocation2], %s767_s21 }
  0x2c   : > { %1059 = dma.done.wait (%p1193_p4), %s341_s23, 128  }
  0x2d   : > { %1061 = vsyncadd (%p1193_p4), %s341_s23, 4294967168 }
  0x2e   : > { %1063 = dma.done.wait (%p1183_p1), [#allocation6], 128  }
  0x2f   : > { %1065 = vsyncadd (%p1183_p1), [#allocation6], 4294967168 }
  0x30   : > { %1067 = dma.done.wait (%p1183_p1), [#allocation9], 128  }
  0x31   : > { %1069 = vsyncadd (%p1183_p1), [#allocation9], 4294967168  ;;  %v1101_v0 = vmov 2   ;;  %v1102_v1 = vmov 0   ;;  %v407_v2 = vld [vmem:[%s344_s1] sm:$0xff]  ;;  %s1103_s3 = smov 16   ;;  %v432_v10 = vlaneseq }
  0x32   : > { %883 = vset.pattern.permute.xlu0 %v1101_v0  ;;  %884 = vset.pattern.permute.xlu1 %v1102_v1  ;;  %v408_v3 = vld [vmem:[#allocation5] sm:$0xf]  ;;  %423 = vst [vmem:[#allocation1] ss:$2 sm:$0xff] %v407_v2  ;;  %v1104_v6 = vmov 1   ;;  %s1105_s6 = smov 112  }
  0x33   : > { %881 = vset.pattern.permute.xlu2 %v1102_v1  ;;  %v409_v9 = vld [vmem:[%s1345_s2] sm:$0xf]  ;;  %v1277_v13 = vand.u32 127, %v432_v10  ;;  %v1106_v16 = vmov 839922192   ;;  %vm454_vm2 = vcmask 1043456  }
  0x34   : > { %446 = vperm.xlu2 %881, %v408_v3   ;;  %v437_v14 = vld [vmem:[%s1348_s5] ss:$4 sm:$0x3]  ;;  %v417_v17 = vunpack.c.l.s4 %v1106_v16  ;;  %v772_v25 = vld [vmem:[%s1348_s5 + $0x2] ss:$4 sm:$0x3] }
  0x35   : > { %vm434_vm0 = vcmp.lt.s32.totalorder %v1277_v13, 16  ;;  %v440_v15 = vperm.slane %v437_v14, 1  ;;  %v439_v21 = vperm.slane %v437_v14, 0  ;;  %vm467_vm1 = vcmp.lt.s32.totalorder %v1277_v13, 112  ;;  %s1107_s13 = smov 1   ;;  %s1108_s14 = smov 127  }
  0x36   : > { %v1283_v24 = vunpack.c.0.s8 %v417_v17  ;;  %v473_v29 = vperm.slane %v772_v25, 0  ;;  %v474_v30 = vperm.slane %v772_v25, 1  ;;  %v410_v53 = vld [vmem:[#allocation7] sm:$0xf]  ;;  %v411_v56 = vld [vmem:[%s1347_s4] sm:$0xf] }
  0x37   : > { %v524_v58 = vld [vmem:[#allocation8] ss:$4 sm:$0x3]  ;;  %vm521_vm3 = vcmp.lt.s32.totalorder %v1277_v13, 1  ;;  %vm553_vm4 = vcmp.lt.s32.totalorder %v1277_v13, 127  ;;  %s779_s23 = sshll.u32 %s1088_s27, 3 }
  0x38   : > { %v527_v61 = vperm.slane %v524_v58, 1  ;;  %s398_s27 = scalar_lea.vmem [#allocation10], %s767_s21  ;;  %s589_s16 = scalar_lea.sflag [#allocation4], %s1254_s20 }
  0x39   : > { %v424_v4 = vld.sshfl [vmem:[#allocation1] sm:$0xff pattern:$0x75316420]  ;;  %v425_v5 = vld.sshfl [vmem:[#allocation1 + $0x8] sm:$0xff pattern:$0x75316420] }
  0x3a   : > { %428 = vrot.lane.b32.xlu0 %v424_v4, %s1103_s3  ;;  %458 = vst [vmem:[#allocation1] ss:$2 sm:$0xff] %v407_v2  ;;  %v526_v4 = vperm.slane %v524_v58, 0  ;;  %s604_s9 = sshll.u32 %s398_s27, 4  ;;  %s1026_s21 = scalar_lea.hbm %s1350_s7, 16  ;;  %s605_s9 = int_to_ptr.vmem [resolvable:$true] %s604_s9 }
  0x3c   : > { %882 = vset.pattern.permute.xlu2 %v1104_v6 }
  0x3d   : > { %414 = vperm.xlu2 %882, %v408_v3  }
  0x41   : > { %v459_v7 = vld.sshfl [vmem:[#allocation1] sm:$0xff pattern:$0x75316420]  ;;  %v460_v8 = vld.sshfl [vmem:[#allocation1 + $0x8] sm:$0xff pattern:$0x75316420] }
  0x42   : > { %430 = vrot.lane.b32.xlu0 %v425_v5, %s1103_s3  ;;  %463 = vrot.lane.b32.xlu1 %v459_v7, %s1105_s6 }
  0x4a   : > { %465 = vrot.lane.b32.xlu1 %v460_v8, %s1105_s6  ;;  %480 = vperm.xlu0 %883, %v408_v3   ;;  %v557_v3 = vld [vmem:[#allocation8 + $0x2] ss:$4 sm:$0x3]  ;;  %s602_s6 = scalar_lea.hbm %s1350_s7, %s779_s23 }
  0x4b   : > { %s606_s11 = sshll.u32 %s602_s6, 4  ;;  %s607_s11 = int_to_ptr.hbm [resolvable:$true] %s606_s11 }
  0x4c   : > { %s1020_s15 = sshra.s32 %s607_s11, 4  ;;  %s1021_s15 = int_to_ptr.hbm [resolvable:$true] %s1020_s15 }
  0x4d   : > { %s1022_s22 = scalar_lea.hbm %s1021_s15, 8  ;;  %p1027_p11 = scmp.lt.s32.totalorder %s1021_s15, %s1350_s7 }
  0x4e   : > { %p1023_p1 = scmp.ne.s32.totalorder %s1021_s15, %s1022_s22  ;;  %p1028_p12 = scmp.lt.s32.totalorder %s1026_s21, %s1022_s22 }
  0x50   : > { %p1024_p4 = pnand %p1023_p1, %p1234_p5  ;;  %p1029_p13 = por %p1028_p12, %p1027_p11 }
  0x52   : > { %493 = vperm.xlu1 %884, %v409_v9   ;;  %p1025_p8 = pneg %p1024_p4 }
  0x54   : > { %p1030_p0 = pnand %p1029_p13, %p1025_p8 }
  0x8e   : > { %v447_v12 = vpop.permute.xlu2 %446 }
  0x97   : > { %v415_v27 = vpop.permute.xlu2 %414 }
  0x98   : > { %v419_v31 = vperm.slane %v415_v27, %v1283_v24 }
  0x9a   : > { %v421_v40 = vmul.f32 %v419_v31, %v407_v2 }
  0xac   : > { %v429_v11 = vpop.permute.xlu0 %428 }
  0xb4   : > { %v431_v18 = vpop.permute.xlu0 %430  ;;  %v464_v19 = vpop.permute.xlu1 %463 }
  0xb5   : > { %v435_v20 = vsel %vm434_vm0, %v429_v11, %v431_v18  ;;  %v436_v23 = vsel %vm434_vm0, %v431_v18, %v429_v11  ;;  %v559_v11 = vperm.slane %v557_v3, 0 }
  0xb6   : > { %v444_v22 = vmul.f32 %v440_v15, %v435_v20  ;;  %v443_v28 = vmul.f32 %v439_v21, %v436_v23 }
  0xb8   : > { %v450_v26 = vmul.f32 %v447_v12, %v444_v22  ;;  %v449_v37 = vmul.f32 %v447_v12, %v443_v28 }
  0xba   : > { %v453_v32 = vrot.slane %v450_v26, 4 }
  0xbc   : > { %v466_v33 = vpop.permute.xlu1 %465  ;;  %v481_v36 = vpop.permute.xlu0 %480  ;;  %v455_v41 = vsel %vm454_vm2, %v449_v37, %v453_v32 }
  0xbd   : > { %v468_v34 = vsel %vm467_vm1, %v464_v19, %v466_v33  ;;  %v469_v35 = vsel %vm467_vm1, %v466_v33, %v464_v19  ;;  %v457_v45 = vadd.f32 %v455_v41, %v421_v40 }
  0xbe   : > { %v477_v38 = vmul.f32 %v473_v29, %v468_v34  ;;  %v478_v39 = vmul.f32 %v474_v30, %v469_v35 }
  0xc0   : > { %v484_v42 = vmul.f32 %v481_v36, %v478_v39  ;;  %v483_v43 = vmul.f32 %v481_v36, %v477_v38 }
  0xc2   : > { %v487_v44 = vrot.slane %v484_v42, 4 }
  0xc4   : > { %v488_v46 = vsel %vm454_vm2, %v483_v43, %v487_v44  ;;  %v494_v47 = vpop.permute.xlu1 %493 }
  0xc5   : > { %v490_v48 = vadd.f32 %v488_v46, %v457_v45  ;;  %v498_v49 = vperm.slane %v494_v47, %v1283_v24 }
  0xc7   : > { %v500_v50 = vadd.f32 %v498_v49, %v490_v48 }
  0xc9   : > { %512 = vst [vmem:[#allocation1] ss:$2 sm:$0xff] %v500_v50 }
  0xd0   : > { %v514_v51 = vld.sshfl [vmem:[#allocation1 + $0x8] sm:$0xff pattern:$0x75316420]  ;;  %v513_v52 = vld.sshfl [vmem:[#allocation1] sm:$0xff pattern:$0x75316420] }
  0xd1   : > { %519 = vrot.lane.b32.xlu1 %v514_v51, %s1107_s13  ;;  %517 = vrot.lane.b32.xlu2 %v513_v52, %s1107_s13  ;;  %544 = vst [vmem:[#allocation1] ss:$2 sm:$0xff] %v500_v50 }
  0xd8   : > { %v546_v54 = vld.sshfl [vmem:[#allocation1 + $0x8] sm:$0xff pattern:$0x75316420]  ;;  %v545_v55 = vld.sshfl [vmem:[#allocation1] sm:$0xff pattern:$0x75316420] }
  0xd9   : > { %533 = vperm.xlu1 %884, %v410_v53   ;;  %551 = vrot.lane.b32.xlu0 %v546_v54, %s1108_s14 }
  0xda   : > { %549 = vrot.lane.b32.xlu2 %v545_v55, %s1108_s14 }
  0xe1   : > { %579 = vperm.xlu1 %884, %v411_v56   ;;  %566 = vperm.xlu0 %883, %v410_v53  }
  0xe2   : > { %503 = vperm.xlu2 %882, %v410_v53  }
  0xe9   : > { %885 = vset.pattern.permute.xlu0 %v1102_v1  ;;  %v560_v1 = vperm.slane %v557_v3, 1 }
 0x12b   : > { %v518_v57 = vpop.permute.xlu2 %517 }
 0x134   : > { %v550_v60 = vpop.permute.xlu2 %549 }
 0x13c   : > { %v504_v7 = vpop.permute.xlu2 %503 }
 0x13d   : > { %v508_v12 = vperm.slane %v504_v7, %v1283_v24 }
 0x13f   : > { %v510_v13 = vmul.f32 %v508_v12, %v500_v50 }
 0x143   : > { %v520_v59 = vpop.permute.xlu1 %519 }
 0x144   : > { %v522_v62 = vsel %vm521_vm3, %v518_v57, %v520_v59  ;;  %v523_v6 = vsel %vm521_vm3, %v520_v59, %v518_v57 }
 0x145   : > { %v531_v63 = vmul.f32 %v527_v61, %v522_v62  ;;  %v530_v9 = vmul.f32 %v526_v4, %v523_v6 }
 0x14b   : > { %v534_v0 = vpop.permute.xlu1 %533  ;;  %v552_v2 = vpop.permute.xlu0 %551 }
 0x14c   : > { %v537_v5 = vmul.f32 %v534_v0, %v531_v63  ;;  %v555_v8 = vsel %vm553_vm4, %v552_v2, %v550_v60  ;;  %v554_v14 = vsel %vm553_vm4, %v550_v60, %v552_v2  ;;  %v536_v15 = vmul.f32 %v534_v0, %v530_v9 }
 0x14d   : > { %v564_v16 = vmul.f32 %v560_v1, %v555_v8  ;;  %v563_v19 = vmul.f32 %v559_v11, %v554_v14 }
 0x14e   : > { %v540_v10 = vrot.slane %v537_v5, 4 }
 0x150   : > { %v541_v18 = vsel %vm454_vm2, %v536_v15, %v540_v10 }
 0x151   : > { %v543_v25 = vadd.f32 %v541_v18, %v510_v13 }
 0x153   : > { %v567_v17 = vpop.permute.xlu0 %566  ;;  %v580_v21 = vpop.permute.xlu1 %579 }
 0x154   : > { %v570_v20 = vmul.f32 %v567_v17, %v564_v16  ;;  %v569_v22 = vmul.f32 %v567_v17, %v563_v19  ;;  %v584_v27 = vperm.slane %v580_v21, %v1283_v24 }
 0x156   : > { %v573_v23 = vrot.slane %v570_v20, 4 }
 0x158   : > { %v574_v26 = vsel %vm454_vm2, %v569_v22, %v573_v23 }
 0x159   : > { %v576_v28 = vadd.f32 %v574_v26, %v543_v25 }
 0x15b   : > { %v586_v29 = vadd.f32 %v584_v27, %v576_v28 }
 0x15d   : > { %587 = vst [vmem:[%s398_s27] sm:$0xff] %v586_v29 }
 0x15e   : > { %1033 = shalt.err (!%p1030_p0)
}
 0x15f   : > { %794 = dma.vmem_to_hbm [thread:$0]  (%p1234_p5), %s605_s9, 128, %s607_s11, %s589_s16  }
 0x160 PF: > { %s618_s20 = sand.u32 1, %s1076_s24   ;;  %p811_p3 = pnand %p762_p9, %p1198_p6 }
 0x161   : > { %s619_s10 = scalar_lea.sflag [#allocation4], %s618_s20 }
 0x162   : > { %p812_p7 = pneg %p811_p3 }
 0x164   : > { %1071 = dma.done.wait (%p812_p7), %s619_s10, 128  }
 0x165   : > { %1073 = vsyncadd (%p812_p7), %s619_s10, 4294967168  ;;  %s25_s29 = sadd.s32 1, %s1096_s29   ;;  %s1364_s24 = smov %s1080_s25 }
 0x166   : > { %p22_p10 = scmp.ge.s32.totalorder %s25_s29, 4   ;;  %s1365_s25 = smov %s1084_s26 }
 0x167   : > { %s1366_s26 = smov %s1243_s30  ;;  %s1367_s27 = smov %s1092_s28 }
 0x168   : > { %s1368_s28 = smov %s1370_s19  ;;  %24 = sbr.rel (!%p22_p10) target bundleno = 12 (0xc), region = 115 }
 0x16d   :  { %625 = vsyncpa [#allocation3], 1 }
 0x16e   :  { %627 = vsyncpa [#allocation3 + $0x1], 1 }
 0x16f   :  { %628 = vsyncpa [#allocation6], 1 }
 0x170   :  { %629 = vsyncpa [#allocation9], 1 }
 0x171   :  { %630 = vsyncpa [#allocation4], 1 }
 0x172   :  { %632 = vsyncpa [#allocation4 + $0x1], 1 }

</bundles_post_ra>
